<compile_context>
chip_gen: v7x
topology: tpu7x:2x2x1
jax: 0.10.0
libtpu: 0.0.40
codegen_flags: <defaults>
</compile_context>

<pallas_src>
import functools

import jax
import jax.numpy as jnp
from jax.experimental import pallas as pl
from jax.experimental.pallas import tpu as pltpu


def _round_up(x, m):
    return ((x + m - 1) // m) * m


def _focal_kernel(preds_ref, labels_ref, out_ref, *,
                  alpha_list, gamma, num_classes, n_valid, lanes_total,
                  tile_l, needs_mask):
    labels = labels_ref[...]                                    # (8, tile_l) int32
    x = preds_ref[...].astype(jnp.float32)                      # (C*8, tile_l)
    rows = [x[8 * c:8 * (c + 1), :] for c in range(num_classes)]  # each (8, tile_l)

    # Class-axis max, unrolled over the tiny static class count (pure VPU,
    # no cross-lane reductions).
    m = rows[0]
    for c in range(1, num_classes):
        m = jnp.maximum(m, rows[c])

    # exp terms are shared between the softmax denominator and pt (saves 1 exp).
    exps = [jnp.exp(r - m) for r in rows]
    s = exps[0]
    for c in range(1, num_classes):
        s = s + exps[c]
    log_s = jnp.log(s)

    # Label / exp / alpha gathers as select chains, reusing the same masks.
    x_y = rows[0]
    e_y = exps[0]
    alpha_t = jnp.float32(alpha_list[0])
    for c in range(1, num_classes):
        is_c = labels == c
        x_y = jnp.where(is_c, rows[c], x_y)
        e_y = jnp.where(is_c, exps[c], e_y)
        alpha_t = jnp.where(is_c, jnp.float32(alpha_list[c]), alpha_t)

    logpt = x_y - m - log_s                                     # log softmax @ label
    pt = e_y * pl.reciprocal(s, approx=True)                    # softmax @ label (no exp)

    one_minus_pt = jnp.maximum(1.0 - pt, 0.0)                   # clamp approx-recip overshoot
    if float(gamma) == int(gamma) and int(gamma) >= 0:
        focal = jnp.ones_like(pt)
        for _ in range(int(gamma)):
            focal = focal * one_minus_pt
    else:
        focal = jnp.power(one_minus_pt, jnp.float32(gamma))

    loss = -alpha_t * focal * logpt                             # (8, tile_l)

    # Per-tile partial sums folded into one (8, 128) slab: static 128-aligned
    # lane-chunk adds (VPU), no cross-lane reduce inside the kernel.
    def _slab(v):
        acc = v[:, 0:128]
        for j in range(1, tile_l // 128):
            acc = acc + v[:, j * 128:(j + 1) * 128]
        return acc

    if needs_mask:
        pid = pl.program_id(0)
        last = pl.num_programs(0) - 1

        @pl.when(pid == last)
        def _masked():
            lane = jax.lax.broadcasted_iota(jnp.int32, (8, tile_l), 1) + pid * tile_l
            sub = jax.lax.broadcasted_iota(jnp.int32, (8, tile_l), 0)
            valid = (lane < lanes_total) & (sub * lanes_total + lane < n_valid)
            # Select (NOT multiply-by-mask): garbage lanes may hold Inf/NaN.
            out_ref[0] = _slab(jnp.where(valid, loss, 0.0))

        @pl.when(pid != last)
        def _full():
            out_ref[0] = _slab(loss)
    else:
        out_ref[0] = _slab(loss)


def focal_loss_pallas(preds, labels, *, alpha=0.25, gamma=2.0, num_classes=3,
                      size_average=True, tile_samples=131072,
                      preds_is_class_major=False):
    """Forward of the PyTorch `focal_loss` module as a Pallas TPU kernel.

    preds:  [..., C] logits (or (C, M) class-major when preds_is_class_major).
    labels: [...] integer class ids (same leading shape as preds without C).
    tile_samples: samples per grid step (default 131072 ≈ 4.7 MiB VMEM
      double-buffered; suits v5e/v6e/v7x — bump for very large M on v7x).
    """
    # alpha setup matching the module __init__ (static -> baked into kernel).
    if isinstance(alpha, (list, tuple)):
        assert len(alpha) == num_classes
        alpha_list = tuple(float(a) for a in alpha)
    else:
        assert alpha < 1
        alpha_list = (float(alpha),) + (1.0 - float(alpha),) * (num_classes - 1)

    labels_flat = labels.reshape(-1).astype(jnp.int32)

    if preds_is_class_major:
        C, M = preds.shape
        assert C == num_classes
        preds_cm = preds
    else:
        C = preds.shape[-1]
        assert C == num_classes
        preds_mc = preds.reshape(-1, C)
        M = preds_mc.shape[0]
    assert labels_flat.shape[0] == M

    Mp = _round_up(M, 8)           # class-major reshape needs M % 8 == 0 (<=7 row pad)
    L = Mp // 8                    # logical lanes (samples per sublane row)

    if preds_is_class_major:
        if Mp != M:
            preds_cm = jnp.pad(preds_cm, ((0, 0), (0, Mp - M)))
        preds_cm8 = preds_cm.reshape(C * 8, L)          # free row-major reshape
    else:
        if Mp != M:
            preds_mc = jnp.pad(preds_mc, ((0, Mp - M), (0, 0)))
        # Single relayout pass of preds (sample-major -> class-major, sublane-dense).
        # TODO(synk): have the upstream producer emit class-major preds and pass
        # preds_is_class_major=True so this one HBM transpose disappears entirely.
        preds_cm8 = preds_mc.reshape(8, L, C).transpose(2, 0, 1).reshape(C * 8, L)

    if Mp != M:
        labels_flat = jnp.pad(labels_flat, (0, Mp - M))
    labels_8l = labels_flat.reshape(8, L)               # free row-major reshape

    # Tiny inputs only: give the single block a full 128-lane extent (costless).
    L_arr = L
    if L < 128:
        L_arr = 128
        preds_cm8 = jnp.pad(preds_cm8, ((0, 0), (0, L_arr - L)))
        labels_8l = jnp.pad(labels_8l, ((0, 0), (0, L_arr - L)))

    # Lane-tile size: tile_samples samples per grid step = 8 sublanes x tile_l lanes.
    tile_l = _round_up(max(128, int(tile_samples) // 8), 128)
    tile_l = min(tile_l, _round_up(L_arr, 128))
    num_tiles = (L_arr + tile_l - 1) // tile_l
    needs_mask = (Mp != M) or (L_arr != L) or (L_arr % tile_l != 0)

    kernel = functools.partial(
        _focal_kernel,
        alpha_list=alpha_list, gamma=float(gamma), num_classes=num_classes,
        n_valid=M, lanes_total=L, tile_l=tile_l, needs_mask=needs_mask)

    partials = pl.pallas_call(
        kernel,
        out_shape=jax.ShapeDtypeStruct((num_tiles, 8, 128), jnp.float32),
        grid=(num_tiles,),
        in_specs=[
            pl.BlockSpec((C * 8, tile_l), lambda i: (0, i)),   # class-major preds tile
            pl.BlockSpec((8, tile_l), lambda i: (0, i)),       # labels tile
        ],
        out_specs=pl.BlockSpec((1, 8, 128), lambda i: (i, 0, 0)),
        compiler_params=pltpu.CompilerParams(
            dimension_semantics=("parallel",)),                # no cross-tile carry
    )(preds_cm8, labels_8l)

    total = jnp.sum(partials, dtype=jnp.float32)               # tiny final combine
    if size_average:
        return total / jnp.float32(M)
    return total


def _focal_loss_ref(preds, labels, *, alpha=0.25, gamma=2.0, num_classes=3,
                    size_average=True):
    """Pure-JAX reference mirroring the PyTorch forward."""
    if isinstance(alpha, (list, tuple)):
        alpha_vec = jnp.asarray(alpha, jnp.float32)
    else:
        alpha_vec = jnp.concatenate(
            [jnp.array([alpha], jnp.float32),
             jnp.full((num_classes - 1,), 1.0 - alpha, jnp.float32)])
    x = preds.reshape(-1, preds.shape[-1]).astype(jnp.float32)
    y = labels.reshape(-1).astype(jnp.int32)
    p = jax.nn.softmax(x, axis=1)
    logp = jnp.log(p)
    pt = jnp.take_along_axis(p, y[:, None], axis=1)[:, 0]
    logpt = jnp.take_along_axis(logp, y[:, None], axis=1)[:, 0]
    at = alpha_vec[y]
    loss = -at * (1.0 - pt) ** gamma * logpt
    return jnp.mean(loss) if size_average else jnp.sum(loss)


if __name__ == "__main__":
    key = jax.random.PRNGKey(0)
    k1, k2, k3, k4, k5, k6, k7, k8 = jax.random.split(key, 8)
    C = 3

    # Case 1: detection-style [B, N, C], tiny -> single tile with masked lanes.
    B, N = 2, 8
    p1 = jax.random.normal(k1, (B, N, C), dtype=jnp.float32)
    y1 = jax.random.randint(k2, (B, N), 0, C, dtype=jnp.int32)
    out1 = jax.block_until_ready(
        focal_loss_pallas(p1, y1, alpha=0.25, gamma=2, num_classes=C,
                          size_average=True))
    ref1 = _focal_loss_ref(p1, y1, alpha=0.25, gamma=2.0, num_classes=C,
                           size_average=True)
    assert jnp.allclose(out1, ref1, rtol=2e-3, atol=1e-5), (out1, ref1)

    # Case 2: classification-style [M, C], several tiles, partial last tile.
    M2 = 3000
    p2 = jax.random.normal(k3, (M2, C), dtype=jnp.float32)
    y2 = jax.random.randint(k4, (M2,), 0, C, dtype=jnp.int32)
    out2 = jax.block_until_ready(
        focal_loss_pallas(p2, y2, alpha=0.25, gamma=2, num_classes=C,
                          size_average=True, tile_samples=1024))
    ref2 = _focal_loss_ref(p2, y2, alpha=0.25, gamma=2.0, num_classes=C,
                           size_average=True)
    assert jnp.allclose(out2, ref2, rtol=2e-3, atol=1e-5), (out2, ref2)

    # Case 3: M % 8 != 0 (tiny tail pad), list alpha, sum reduction.
    M3 = 37
    alpha3 = [0.2, 0.3, 0.5]
    p3 = jax.random.normal(k5, (M3, C), dtype=jnp.float32)
    y3 = jax.random.randint(k6, (M3,), 0, C, dtype=jnp.int32)
    out3 = jax.block_until_ready(
        focal_loss_pallas(p3, y3, alpha=alpha3, gamma=2, num_classes=C,
                          size_average=False))
    ref3 = _focal_loss_ref(p3, y3, alpha=alpha3, gamma=2.0, num_classes=C,
                           size_average=False)
    assert jnp.allclose(out3, ref3, rtol=2e-3, atol=1e-4), (out3, ref3)

    # Case 4: evenly divisible shapes -> multi-tile, mask code statically dropped.
    M4 = 8192
    p4 = jax.random.normal(k7, (M4, C), dtype=jnp.float32)
    y4 = jax.random.randint(k8, (M4,), 0, C, dtype=jnp.int32)
    out4 = jax.block_until_ready(
        focal_loss_pallas(p4, y4, alpha=0.25, gamma=2, num_classes=C,
                          size_average=True, tile_samples=4096))
    ref4 = _focal_loss_ref(p4, y4, alpha=0.25, gamma=2.0, num_classes=C,
                           size_average=True)
    assert jnp.allclose(out4, ref4, rtol=2e-3, atol=1e-5), (out4, ref4)

    print("KERNEL_OK")
</pallas_src>

<mosaic_0001>
module attributes {stable_mosaic.version = 11 : i64} {
  func.func @_focal_kernel(%arg0: i32, %arg1: memref<24x128xf32, #tpu.memory_space<vmem>>, %arg2: memref<8x128xi32, #tpu.memory_space<vmem>>, %arg3: memref<1x8x128xf32, #tpu.memory_space<vmem>>) attributes {dimension_semantics = [#tpu.dimension_semantics<parallel>], iteration_bounds = array<i64: 1>, scalar_prefetch = 0 : i64, scratch_operands = 0 : i64, tpu.core_type = #tpu.core_type<tc>, window_params = [{transform_indices = @transform_0, window_bounds = array<i64: 24, 128>}, {transform_indices = @transform_1, window_bounds = array<i64: 8, 128>}, {transform_indices = @transform_2, window_bounds = array<i64: 1, 8, 128>}]} {
    %c0 = arith.constant 0 : index
    %c0_0 = arith.constant 0 : index
    %0 = vector.load %arg2[%c0, %c0_0] : memref<8x128xi32, #tpu.memory_space<vmem>>, vector<8x128xi32>
    %c0_1 = arith.constant 0 : index
    %c0_2 = arith.constant 0 : index
    %1 = vector.load %arg1[%c0_1, %c0_2] : memref<24x128xf32, #tpu.memory_space<vmem>>, vector<24x128xf32>
    %2 = vector.extract_strided_slice %1 {offsets = [0, 0], sizes = [8, 128], strides = [1, 1]} : vector<24x128xf32> to vector<8x128xf32>
    %3 = vector.extract_strided_slice %1 {offsets = [8, 0], sizes = [8, 128], strides = [1, 1]} : vector<24x128xf32> to vector<8x128xf32>
    %4 = vector.extract_strided_slice %1 {offsets = [16, 0], sizes = [8, 128], strides = [1, 1]} : vector<24x128xf32> to vector<8x128xf32>
    %5 = arith.maximumf %2, %3 : vector<8x128xf32>
    %6 = arith.maximumf %5, %4 : vector<8x128xf32>
    %7 = arith.subf %2, %6 : vector<8x128xf32>
    %8 = math.exp %7 : vector<8x128xf32>
    %9 = arith.subf %3, %6 : vector<8x128xf32>
    %10 = math.exp %9 : vector<8x128xf32>
    %11 = arith.subf %4, %6 : vector<8x128xf32>
    %12 = math.exp %11 : vector<8x128xf32>
    %13 = arith.addf %8, %10 : vector<8x128xf32>
    %14 = arith.addf %13, %12 : vector<8x128xf32>
    %15 = math.log %14 : vector<8x128xf32>
    %c1_i32 = arith.constant 1 : i32
    %16 = vector.broadcast %c1_i32 : i32 to vector<8x128xi32>
    %17 = arith.cmpi eq, %0, %16 : vector<8x128xi32>
    %18 = arith.select %17, %3, %2 : vector<8x128xi1>, vector<8x128xf32>
    %19 = arith.select %17, %10, %8 : vector<8x128xi1>, vector<8x128xf32>
    %cst = arith.constant 7.500000e-01 : f32
    %cst_3 = arith.constant 2.500000e-01 : f32
    %20 = vector.broadcast %cst : f32 to vector<8x128xf32>
    %21 = vector.broadcast %cst_3 : f32 to vector<8x128xf32>
    %22 = arith.select %17, %20, %21 : vector<8x128xi1>, vector<8x128xf32>
    %c2_i32 = arith.constant 2 : i32
    %23 = vector.broadcast %c2_i32 : i32 to vector<8x128xi32>
    %24 = arith.cmpi eq, %0, %23 : vector<8x128xi32>
    %25 = arith.select %24, %4, %18 : vector<8x128xi1>, vector<8x128xf32>
    %26 = arith.select %24, %12, %19 : vector<8x128xi1>, vector<8x128xf32>
    %cst_4 = arith.constant 7.500000e-01 : f32
    %27 = vector.broadcast %cst_4 : f32 to vector<8x128xf32>
    %28 = arith.select %24, %27, %22 : vector<8x128xi1>, vector<8x128xf32>
    %29 = arith.subf %25, %6 : vector<8x128xf32>
    %30 = arith.subf %29, %15 : vector<8x128xf32>
    %31 = tpu.reciprocal %14 {approx = true} : vector<8x128xf32> -> vector<8x128xf32>
    %32 = arith.mulf %26, %31 : vector<8x128xf32>
    %cst_5 = arith.constant 1.000000e+00 : f32
    %33 = vector.broadcast %cst_5 : f32 to vector<8x128xf32>
    %34 = arith.subf %33, %32 : vector<8x128xf32>
    %cst_6 = arith.constant 0.000000e+00 : f32
    %35 = vector.broadcast %cst_6 : f32 to vector<8x128xf32>
    %36 = arith.maximumf %34, %35 : vector<8x128xf32>
    %cst_7 = arith.constant 1.000000e+00 : f32
    %37 = vector.broadcast %cst_7 : f32 to vector<8x128xf32>
    %38 = arith.mulf %37, %36 : vector<8x128xf32>
    %39 = arith.mulf %38, %36 : vector<8x128xf32>
    %cst_8 = arith.constant 0.000000e+00 : f32
    %40 = vector.broadcast %cst_8 : f32 to vector<8x128xf32>
    %41 = arith.subf %40, %28 : vector<8x128xf32>
    %42 = arith.mulf %41, %39 : vector<8x128xf32>
    %43 = arith.mulf %42, %30 : vector<8x128xf32>
    %c0_i32 = arith.constant 0 : i32
    %44 = arith.cmpi eq, %arg0, %c0_i32 : i32
    %45 = arith.extui %44 : i1 to i32
    %c0_i32_9 = arith.constant 0 : i32
    %46 = arith.cmpi ne, %45, %c0_i32_9 : i32
    scf.if %46 {
      %50 = tpu.iota {dimensions = array<i32: 1>} : vector<8x128xi32>
      %c128_i32 = arith.constant 128 : i32
      %51 = arith.muli %arg0, %c128_i32 : i32
      %52 = vector.broadcast %51 : i32 to vector<8x128xi32>
      %53 = arith.addi %50, %52 : vector<8x128xi32>
      %54 = tpu.iota {dimensions = array<i32: 0>} : vector<8x128xi32>
      %c2_i32_12 = arith.constant 2 : i32
      %55 = vector.broadcast %c2_i32_12 : i32 to vector<8x128xi32>
      %56 = arith.cmpi slt, %53, %55 : vector<8x128xi32>
      %c2_i32_13 = arith.constant 2 : i32
      %57 = vector.broadcast %c2_i32_13 : i32 to vector<8x128xi32>
      %58 = arith.muli %54, %57 : vector<8x128xi32>
      %59 = arith.addi %58, %53 : vector<8x128xi32>
      %c16_i32 = arith.constant 16 : i32
      %60 = vector.broadcast %c16_i32 : i32 to vector<8x128xi32>
      %61 = arith.cmpi slt, %59, %60 : vector<8x128xi32>
      %62 = arith.andi %56, %61 : vector<8x128xi1>
      %cst_14 = arith.constant 0.000000e+00 : f32
      %63 = vector.broadcast %cst_14 : f32 to vector<8x128xf32>
      %64 = arith.select %62, %43, %63 : vector<8x128xi1>, vector<8x128xf32>
      %c0_15 = arith.constant 0 : index
      %c0_16 = arith.constant 0 : index
      %c0_17 = arith.constant 0 : index
      %65 = vector.load %arg3[%c0_15, %c0_16, %c0_17] : memref<1x8x128xf32, #tpu.memory_space<vmem>>, vector<1x8x128xf32>
      %66 = vector.shape_cast %65 : vector<1x8x128xf32> to vector<8x128xf32>
      %67 = vector.shape_cast %64 : vector<8x128xf32> to vector<1x8x128xf32>
      tpu.vector_store %arg3[%c0_15, %c0_16, %c0_17], %67 {strides = array<i32>} : memref<1x8x128xf32, #tpu.memory_space<vmem>>, vector<1x8x128xf32>,
    } else {
    }
    %c0_i32_10 = arith.constant 0 : i32
    %47 = arith.cmpi ne, %arg0, %c0_i32_10 : i32
    %48 = arith.extui %47 : i1 to i32
    %c0_i32_11 = arith.constant 0 : i32
    %49 = arith.cmpi ne, %48, %c0_i32_11 : i32
    scf.if %49 {
      %c0_12 = arith.constant 0 : index
      %c0_13 = arith.constant 0 : index
      %c0_14 = arith.constant 0 : index
      %50 = vector.load %arg3[%c0_12, %c0_13, %c0_14] : memref<1x8x128xf32, #tpu.memory_space<vmem>>, vector<1x8x128xf32>
      %51 = vector.shape_cast %50 : vector<1x8x128xf32> to vector<8x128xf32>
      %52 = vector.shape_cast %43 : vector<8x128xf32> to vector<1x8x128xf32>
      tpu.vector_store %arg3[%c0_12, %c0_13, %c0_14], %52 {strides = array<i32>} : memref<1x8x128xf32, #tpu.memory_space<vmem>>, vector<1x8x128xf32>,
    } else {
    }
    return
  }
  func.func @transform_0(%arg0: i32) -> (i32, i32) {
    %c0_i32 = arith.constant 0 : i32
    %c0_i32_0 = arith.constant 0 : i32
    return %c0_i32, %arg0 : i32, i32
  }
  func.func @transform_1(%arg0: i32) -> (i32, i32) {
    %c0_i32 = arith.constant 0 : i32
    %c0_i32_0 = arith.constant 0 : i32
    return %c0_i32, %arg0 : i32, i32
  }
  func.func @transform_2(%arg0: i32) -> (i32, i32, i32) {
    %c0_i32 = arith.constant 0 : i32
    %c0_i32_0 = arith.constant 0 : i32
    %c0_i32_1 = arith.constant 0 : i32
    return %arg0, %c0_i32, %c0_i32_0 : i32, i32, i32
  }
}

</mosaic_0001>

<bundles_post_ra>
// kernel: tpu_custom_call.1
= control target key start
LH: loop header
LB: loop body
LE: loop exit
PB: predicated region body
PF: predicated region fallthrough
CT: control target
= control target key end

     0   :  { %7 = vsyncpa [#allocation3], 0  ;;  %s259_s0 = inlined_call_operand.hbm [shape: f32[24,128], index: 0, kind: input, shape index: {}]   ;;  %s260_s1 = inlined_call_operand.hbm [shape: s32[8,128], index: 1, kind: input, shape index: {}]   ;;  %s261_s2 = inlined_call_operand.hbm [shape: f32[1,8,128], index: 2, kind: output, shape index: {}]  }
   0x1   :  { %8 = vsyncpa [#allocation6], 0 }
   0x2   :  { %9 = vsyncpa [#allocation4], 0  ;;  %s202_s9 = smov [#allocation2]   ;;  %s130_s13 = scalar_lea.hbm %s259_s0, 384 }
   0x3   :  { %s15_s10 = sshll.u32 %s202_s9, 4  ;;  %p131_p0 = scmp.ne.s32.totalorder %s259_s0, %s130_s13  ;;  %s16_s10 = int_to_ptr.vmem [resolvable:$true] %s15_s10 }
   0x4   :  { %p134_p1 = scmp.lt.u32.totalorder %s130_s13, %s259_s0 }
   0x6   :  { %p136_p2 = pnand %p134_p1, %p131_p0 }
   0x8   :  { %139 = shalt.err (!%p136_p2)
}
   0x9   :  { %s140_s18 = scalar_lea.vmem %s16_s10, 384  ;;  %p145_p4 = scmp.lt.s32.totalorder %s16_s10, %s16_s10 }
   0xa   :  { %p141_p3 = scmp.ne.s32.totalorder %s16_s10, %s140_s18  ;;  %p146_p5 = scmp.lt.s32.totalorder %s140_s18, %s140_s18 }
   0xc   :  { %p147_p6 = por %p146_p5, %p145_p4 }
   0xe   :  { %p148_p7 = pnand %p147_p6, %p141_p3 }
  0x10   :  { %151 = shalt.err (!%p148_p7)
}
  0x11   :  { %s203_s19 = smov 128   ;;  %s204_s20 = smov 8  }
  0x12   :  { %21 = dma.hbm_to_vmem [thread:$0]  %s259_s0, 384, %s16_s10, [#allocation3], %s203_s19, %s203_s19, %s204_s20  }
  0x13   :  { %s205_s23 = smov [#allocation5]   ;;  %s152_s27 = scalar_lea.hbm %s260_s1, 128 }
  0x14   :  { %s28_s24 = sshll.u32 %s205_s23, 4  ;;  %p153_p8 = scmp.ne.s32.totalorder %s260_s1, %s152_s27  ;;  %s29_s24 = int_to_ptr.vmem [resolvable:$true] %s28_s24 }
  0x15   :  { %p156_p9 = scmp.lt.u32.totalorder %s152_s27, %s260_s1 }
  0x17   :  { %p158_p10 = pnand %p156_p9, %p153_p8 }
  0x19   :  { %161 = shalt.err (!%p158_p10)
}
  0x1a   :  { %s162_s4 = scalar_lea.vmem %s29_s24, 128  ;;  %p167_p12 = scmp.lt.s32.totalorder %s29_s24, %s29_s24 }
  0x1b   :  { %p163_p11 = scmp.ne.s32.totalorder %s29_s24, %s162_s4  ;;  %p168_p13 = scmp.lt.s32.totalorder %s162_s4, %s162_s4 }
  0x1d   :  { %p169_p0 = por %p168_p13, %p167_p12 }
  0x1f   :  { %p170_p1 = pnand %p169_p0, %p163_p11 }
  0x21   :  { %173 = shalt.err (!%p170_p1)
}
  0x22   :  { %31 = dma.hbm_to_vmem [thread:$0]  %s260_s1, 128, %s29_s24, [#allocation6]  }
  0x23   :  { %196 = dma.done.wait [#allocation3], 384  }
  0x24   :  { %197 = vsyncadd [#allocation3], 4294966912 }
  0x25   :  { %198 = dma.done.wait [#allocation6], 128  }
  0x26   :  { %199 = vsyncadd [#allocation6], 4294967168  ;;  %v39_v0 = vld [vmem:[#allocation2] sm:$0xff]  ;;  %v40_v1 = vld [vmem:[#allocation2 + $0x8] sm:$0xff]  ;;  %v79_v17 = vlaneseq  ;;  %v206_v23 = vmov 0.25   ;;  %s207_s1 = smov [#allocation7]  }
  0x27   :  { %v41_v2 = vld [vmem:[#allocation2 + $0x10] sm:$0xff]  ;;  %v42_v3 = vmax.f32 %v39_v0, %v40_v1  ;;  %v38_v16 = vld [vmem:[#allocation5] sm:$0xff]  ;;  %s104_s6 = sshll.u32 %s207_s1, 4  ;;  %s105_s6 = int_to_ptr.vmem [resolvable:$true] %s104_s6 }
  0x28   :  { %vm57_vm0 = vcmp.eq.s32.totalorder %v38_v16, 1  ;;  %vm61_vm1 = vcmp.eq.s32.totalorder %v38_v16, 2  ;;  %v85_v19 = vshrl.u32 %v79_v17, 7  ;;  %v80_v25 = vand.u32 127, %v79_v17  ;;  %s174_s7 = scalar_lea.vmem %s105_s6, 128  ;;  %p179_p3 = scmp.lt.s32.totalorder %s105_s6, %s105_s6 }
  0x29   :  { %v43_v4 = vmax.f32 %v42_v3, %v41_v2  ;;  %v58_v20 = vsel %vm57_vm0, %v40_v1, %v39_v0  ;;  %v60_v24 = vsel %vm57_vm0, 0.75, %v206_v23  ;;  %p175_p2 = scmp.ne.s32.totalorder %s105_s6, %s174_s7  ;;  %p180_p4 = scmp.lt.s32.totalorder %s174_s7, %s174_s7 }
  0x2a   :  { %v87_v26 = vmul.u32 2, %v85_v19  ;;  %v62_v28 = vsel %vm61_vm1, %v41_v2, %v58_v20  ;;  %v64_v30 = vsel %vm61_vm1, 0.75, %v60_v24  ;;  %vm86_vm2 = vcmp.lt.s32.totalorder %v80_v25, 2 }
  0x2b   :  { %v44_v5 = vsub.f32 %v39_v0, %v43_v4  ;;  %v47_v6 = vsub.f32 %v40_v1, %v43_v4  ;;  %v50_v7 = vsub.f32 %v41_v2, %v43_v4  ;;  %v65_v32 = vsub.f32 %v62_v28, %v43_v4  ;;  %p181_p5 = por %p180_p4, %p179_p3 }
  0x2c   :  { %v88_v34 = vadd.s32 %v87_v26, %v80_v25  ;;  %v72_v36 = vsub.f32 0.0, %v64_v30 }
  0x2d   :  { %v45_v8 = vmul.f32 1.442695, %v44_v5  ;;  %v48_v9 = vmul.f32 1.442695, %v47_v6  ;;  %v51_v10 = vmul.f32 1.442695, %v50_v7  ;;  %p182_p6 = pnand %p181_p5, %p175_p2 }
  0x2e   :  { %vm89_vm3 = vcmp.lt.s32.totalorder %v88_v34, 16 }
  0x2f   :  { %120 = vpow2.f32 %v45_v8  ;;  %vm90_vm4 = vmand %vm86_vm2, %vm89_vm3 }
  0x30   :  { %122 = vpow2.f32 %v48_v9 }
  0x31   :  { %124 = vpow2.f32 %v51_v10 }
  0x39   :  { %v121_v11 = vpop.eup %120 }
  0x3a   :  { %v123_v12 = vpop.eup %122 }
  0x3b   :  { %v125_v13 = vpop.eup %124  ;;  %v53_v14 = vadd.f32 %v123_v12, %v121_v11  ;;  %v59_v18 = vsel %vm57_vm0, %v123_v12, %v121_v11 }
  0x3c   :  { %v63_v21 = vsel %vm61_vm1, %v125_v13, %v59_v18 }
  0x3d   :  { %v54_v15 = vadd.f32 %v125_v13, %v53_v14 }
  0x3f   :  { %126 = vlog2.f32 %v54_v15 }
  0x40   :  { %128 = vrcp.f32 %v54_v15 }
  0x49   :  { %v127_v22 = vpop.eup %126 }
  0x4a   :  { %v129_v27 = vpop.eup %128  ;;  %v56_v31 = vmul.f32 0.6931472, %v127_v22 }
  0x4b   :  { %v68_v29 = vmul.f32 %v129_v27, %v63_v21 }
  0x4c   :  { %v66_v37 = vsub.f32 %v65_v32, %v56_v31 }
  0x4d   :  { %v69_v33 = vsub.f32 1.0, %v68_v29 }
  0x4f   :  { %v70_v35 = vmax.f32 %v69_v33, 0.0 }
  0x51   :  { %v71_v38 = vmul.f32 %v70_v35, %v70_v35 }
  0x53   :  { %v73_v39 = vmul.f32 %v72_v36, %v71_v38 }
  0x55   :  { %v74_v40 = vmul.f32 %v73_v39, %v66_v37 }
  0x57   :  { %v91_v41 = vsel %vm90_vm4, %v74_v40, 0.0 }
  0x58   :  { %92 = vst [vmem:[#allocation7] sm:$0xff] %v91_v41 }
  0x59   :  { %185 = shalt.err (!%p182_p6)
}
  0x5a   :  { %s186_s10 = scalar_lea.hbm %s261_s2, 128 }
  0x5b   :  { %p187_p7 = scmp.ne.s32.totalorder %s261_s2, %s186_s10  ;;  %p190_p8 = scmp.lt.u32.totalorder %s186_s10, %s261_s2 }
  0x5d   :  { %p192_p9 = pnand %p190_p8, %p187_p7 }
  0x5f   :  { %195 = shalt.err (!%p192_p9)
}
  0x60   :  { %107 = dma.vmem_to_hbm [thread:$0]  %s105_s6, 128, %s261_s2, [#allocation4]  }
  0x61   :  { %200 = dma.done.wait [#allocation4], 128  }
  0x62   :  { %201 = vsyncadd [#allocation4], 4294967168 }
  0x63   :  { %111 = vsyncpa [#allocation3], 1 }
  0x64   :  { %112 = vsyncpa [#allocation6], 1 }
  0x65   :  { %113 = vsyncpa [#allocation4], 1 }

</bundles_post_ra>
